<compile_context>
chip_gen: v6e
topology: v6e:2x2x1
jax: 0.10.0
libtpu: 0.0.40
codegen_flags: <defaults>
</compile_context>

<pallas_src>
import functools

import jax
import jax.numpy as jnp
import numpy as np
from jax.experimental import pallas as pl
from jax.experimental.pallas import tpu as pltpu


# ----------------------------- Pallas kernel --------------------------------
def _cnn_kernel(emb_ref,          # (2B, S, D)  premise rows [0,B), hypothesis rows [B,2B)
                wcf_ref,          # (K*D + 4F, F)  rows [0,K*D)=conv_w, rows [K*D,K*D+4F)=fc1_w
                bcf_ref,          # (2, F)         row 0 = conv_b, row 1 = fc1_b
                w2_ref,           # (F, LPAD)      fc2 weight, lane-padded
                b2_ref,           # (1, LPAD)      fc2 bias, lane-padded
                out_ref,          # (B, LPAD)      lane-dense logits (slice [:, :L] outside)
                *, kernel_size):
    K = kernel_size
    N, S, D = emb_ref.shape
    F = bcf_ref.shape[1]
    KD = K * D
    B = out_ref.shape[0]
    T = S - K + 1                 # valid conv positions

    emb = emb_ref[...]            # (N, S, D) f32

    # ---- im2col conv: one (N*S, K*D) x (K*D, F) matmul ----
    # Zero-pad K-1 rows at the tail so every time position has a full window;
    # positions t >= T contain padding and are excluded before the max.
    if K > 1:
        padded = jnp.concatenate(
            [emb, jnp.zeros((N, K - 1, D), emb.dtype)], axis=1)          # (N, S+K-1, D)
    else:
        padded = emb
    win = jnp.concatenate([padded[:, k:k + S, :] for k in range(K)],
                          axis=-1)                                       # (N, S, K*D)
    win2 = win.reshape(N * S, KD)        # S is a sublane multiple -> layout no-op

    conv_w = wcf_ref[0:KD, :]            # (K*D, F)
    fc1_w = wcf_ref[KD:KD + 4 * F, :]    # (4F, F)

    conv = jnp.dot(win2, conv_w, preferred_element_type=jnp.float32)     # (N*S, F)
    conv = jnp.maximum(conv + bcf_ref[0:1, :], 0.0)                      # bias + ReLU once
    conv = conv.reshape(N, S, F)
    feat = jnp.max(conv[:, :T, :], axis=1)                               # max over time (N, F)

    fp = feat[:B, :]                     # premise features   (B, F)
    fh = feat[B:, :]                     # hypothesis features (B, F)

    # ---- fc1 as ONE matmul on the lane-concatenated interaction features ----
    x = jnp.concatenate([fp, fh, fp - fh, fp * fh], axis=-1)             # (B, 4F)
    hidden = jnp.tanh(jnp.dot(x, fc1_w, preferred_element_type=jnp.float32)
                      + bcf_ref[1:2, :])

    logits = jnp.dot(hidden, w2_ref[...],
                     preferred_element_type=jnp.float32) + b2_ref[...]   # (B, LPAD)
    out_ref[...] = logits.astype(out_ref.dtype)


# ------------------------------- wrapper -------------------------------------
def cnn_forward(premise_tokens, hypothesis_tokens, params, *, kernel_size):
    K = kernel_size
    D = params["embed"].shape[-1]
    F = params["conv_b"].shape[-1]
    L = params["fc2_b"].shape[-1]
    LPAD = ((L + 127) // 128) * 128
    B = premise_tokens.shape[1]

    # One fused embedding gather, batch-major, premise & hypothesis stacked along batch.
    # (tokens are tiny ints; no float transpose, no redundant astype.)
    tokens = jnp.concatenate([premise_tokens, hypothesis_tokens], axis=1).T   # (2B, S)
    emb = params["embed"][tokens]                                             # (2B, S, D)

    # Parameter packing (one-time, wrapper-side): 5 kernel inputs instead of 11.
    conv_w2d = params["conv_w"].reshape(K * D, F)                             # k-major, d-minor
    fc1_w = jnp.concatenate([params["fc1_wp"], params["fc1_wh"],
                             params["fc1_wd"], params["fc1_wm"]], axis=0)     # (4F, F)
    wcf = jnp.concatenate([conv_w2d, fc1_w], axis=0)                          # (K*D+4F, F)
    bcf = jnp.concatenate([params["conv_b"], params["fc1_b"]], axis=0)        # (2, F)
    w2 = jnp.pad(params["fc2_w"], ((0, 0), (0, LPAD - L)))                    # (F, LPAD)
    b2 = jnp.pad(params["fc2_b"], ((0, 0), (0, LPAD - L)))                    # (1, LPAD)

    vmem = pl.BlockSpec(memory_space=pltpu.MemorySpace.VMEM)
    out = pl.pallas_call(
        functools.partial(_cnn_kernel, kernel_size=K),
        out_shape=jax.ShapeDtypeStruct((B, LPAD), jnp.float32),
        in_specs=[vmem] * 5,
        out_specs=vmem,
    )(emb, wcf, bcf, w2, b2)
    # TODO(synk): at larger batch, add a batch grid with dimension_semantics=("parallel",)
    # so v7x's two TensorCores are both used; unnecessary at B=2.
    return out[:, :L]


# --------------------------- pure-JAX reference -------------------------------
def ref_forward(premise_tokens, hypothesis_tokens, params, *, kernel_size):
    K = kernel_size

    def side(tokens):
        e = jnp.transpose(params["embed"][tokens], (1, 0, 2))              # (B, S, D)
        B, S, D = e.shape
        T = S - K + 1
        windows = jnp.stack([e[:, t:t + K, :] for t in range(T)], axis=1)  # (B, T, K, D)
        conv = jnp.einsum("btkd,kdf->btf", windows, params["conv_w"]) + params["conv_b"]
        return jnp.max(jax.nn.relu(conv), axis=1)                          # (B, F)

    fp, fh = side(premise_tokens), side(hypothesis_tokens)
    pre = (fp @ params["fc1_wp"] + fh @ params["fc1_wh"]
           + (fp - fh) @ params["fc1_wd"] + (fp * fh) @ params["fc1_wm"]
           + params["fc1_b"])
    return jnp.tanh(pre) @ params["fc2_w"] + params["fc2_b"]


# --------------------------------- main ---------------------------------------
if __name__ == "__main__":
    # config: emb_dim=32, filter_num=16, kernel_size=3, n_labels=3; vocab=50
    VOCAB, EMB_DIM, FILTERS, KSIZE, N_LABELS = 50, 32, 16, 3, 3
    SEQ, BATCH = 8, 2

    key = jax.random.PRNGKey(0)
    ks = jax.random.split(key, 12)

    params = {
        # nn.Embedding(len(vocab), emb_dim) initialized from vocab.vectors (synthetic)
        "embed":  jax.random.normal(ks[0], (VOCAB, EMB_DIM), jnp.float32),
        # Conv2d(1, F, (K, D), stride=(1, D)) weight (F,1,K,D) stored as (K, D, F)
        "conv_w": jax.random.normal(ks[1], (KSIZE, EMB_DIM, FILTERS), jnp.float32) * 0.1,
        "conv_b": jax.random.normal(ks[2], (1, FILTERS), jnp.float32) * 0.1,
        # fc1: Linear(4F, F); weight split along the concatenated-input axis into
        # blocks for [p, h, p-h, p*h], each stored transposed as (F_in, F_out)
        "fc1_wp": jax.random.normal(ks[3], (FILTERS, FILTERS), jnp.float32) * 0.1,
        "fc1_wh": jax.random.normal(ks[4], (FILTERS, FILTERS), jnp.float32) * 0.1,
        "fc1_wd": jax.random.normal(ks[5], (FILTERS, FILTERS), jnp.float32) * 0.1,
        "fc1_wm": jax.random.normal(ks[6], (FILTERS, FILTERS), jnp.float32) * 0.1,
        "fc1_b":  jax.random.normal(ks[7], (1, FILTERS), jnp.float32) * 0.1,
        # fc2: Linear(F, n_labels), stored transposed as (F, n_labels)
        "fc2_w":  jax.random.normal(ks[8], (FILTERS, N_LABELS), jnp.float32) * 0.1,
        "fc2_b":  jax.random.normal(ks[9], (1, N_LABELS), jnp.float32) * 0.1,
    }

    # torchtext-style (seq_len, batch) int token tensors; lengths are unused by forward.
    premise_tokens = jax.random.randint(ks[10], (SEQ, BATCH), 0, VOCAB, jnp.int32)
    hypothesis_tokens = jax.random.randint(ks[11], (SEQ, BATCH), 0, VOCAB, jnp.int32)

    out = cnn_forward(premise_tokens, hypothesis_tokens, params, kernel_size=KSIZE)
    out = jax.block_until_ready(out)

    ref = ref_forward(premise_tokens, hypothesis_tokens, params, kernel_size=KSIZE)
    np.testing.assert_allclose(np.asarray(out), np.asarray(ref), rtol=1e-3, atol=1e-3)

    assert out.shape == (BATCH, N_LABELS)
    print("KERNEL_OK")
</pallas_src>

<mosaic_0001>
module attributes {stable_mosaic.version = 11 : i64} {
  func.func @_cnn_kernel(%arg0: memref<4x8x32xf32, #tpu.memory_space<vmem>>, %arg1: memref<160x16xf32, #tpu.memory_space<vmem>>, %arg2: memref<2x16xf32, #tpu.memory_space<vmem>>, %arg3: memref<16x128xf32, #tpu.memory_space<vmem>>, %arg4: memref<1x128xf32, #tpu.memory_space<vmem>>, %arg5: memref<2x128xf32, #tpu.memory_space<vmem>>) attributes {dimension_semantics = [], scalar_prefetch = 0 : i64, scratch_operands = 0 : i64, tpu.core_type = #tpu.core_type<tc>} {
    %c0 = arith.constant 0 : index
    %c0_0 = arith.constant 0 : index
    %c0_1 = arith.constant 0 : index
    %0 = vector.load %arg0[%c0, %c0_0, %c0_1] : memref<4x8x32xf32, #tpu.memory_space<vmem>>, vector<4x8x32xf32>
    %cst = arith.constant 0.000000e+00 : f32
    %1 = vector.broadcast %cst : f32 to vector<4x2x32xf32>
    %2 = tpu.concatenate %0, %1 in 1 : vector<4x8x32xf32>, vector<4x2x32xf32> -> vector<4x10x32xf32>
    %3 = vector.extract_strided_slice %2 {offsets = [0, 0, 0], sizes = [4, 8, 32], strides = [1, 1, 1]} : vector<4x10x32xf32> to vector<4x8x32xf32>
    %4 = vector.extract_strided_slice %2 {offsets = [0, 1, 0], sizes = [4, 8, 32], strides = [1, 1, 1]} : vector<4x10x32xf32> to vector<4x8x32xf32>
    %5 = vector.extract_strided_slice %2 {offsets = [0, 2, 0], sizes = [4, 8, 32], strides = [1, 1, 1]} : vector<4x10x32xf32> to vector<4x8x32xf32>
    %6 = tpu.concatenate %3, %4, %5 in 2 : vector<4x8x32xf32>, vector<4x8x32xf32>, vector<4x8x32xf32> -> vector<4x8x96xf32>
    %7 = vector.shape_cast %6 : vector<4x8x96xf32> to vector<32x96xf32>
    %c0_2 = arith.constant 0 : index
    %c0_3 = arith.constant 0 : index
    %8 = vector.load %arg1[%c0_2, %c0_3] : memref<160x16xf32, #tpu.memory_space<vmem>>, vector<96x16xf32>
    %c96 = arith.constant 96 : index
    %c0_4 = arith.constant 0 : index
    %9 = vector.load %arg1[%c96, %c0_4] : memref<160x16xf32, #tpu.memory_space<vmem>>, vector<64x16xf32>
    %cst_5 = arith.constant dense<0.000000e+00> : vector<32x16xf32>
    %10 = tpu.matmul %7, %8, %cst_5 {dimension_numbers = #tpu.dot_dimension_numbers<[1], [0], [0], [1], [0, 0, 1, 1], [], []>} : vector<32x96xf32>, vector<96x16xf32>, vector<32x16xf32> -> vector<32x16xf32>
    %c0_6 = arith.constant 0 : index
    %c0_7 = arith.constant 0 : index
    %11 = vector.load %arg2[%c0_6, %c0_7] : memref<2x16xf32, #tpu.memory_space<vmem>>, vector<1x16xf32>
    %12 = vector.broadcast %11 : vector<1x16xf32> to vector<32x16xf32>
    %13 = arith.addf %10, %12 : vector<32x16xf32>
    %cst_8 = arith.constant 0.000000e+00 : f32
    %14 = vector.broadcast %cst_8 : f32 to vector<32x16xf32>
    %15 = arith.maximumf %13, %14 : vector<32x16xf32>
    %16 = vector.shape_cast %15 : vector<32x16xf32> to vector<4x8x16xf32>
    %17 = vector.extract_strided_slice %16 {offsets = [0, 0, 0], sizes = [4, 6, 16], strides = [1, 1, 1]} : vector<4x8x16xf32> to vector<4x6x16xf32>
    %cst_9 = arith.constant dense<0xFF800000> : vector<4x16xf32>
    %18 = vector.multi_reduction <maximumf>, %17, %cst_9 [1] : vector<4x6x16xf32> to vector<4x16xf32>
    %19 = vector.extract_strided_slice %18 {offsets = [0, 0], sizes = [2, 16], strides = [1, 1]} : vector<4x16xf32> to vector<2x16xf32>
    %20 = vector.extract_strided_slice %18 {offsets = [2, 0], sizes = [2, 16], strides = [1, 1]} : vector<4x16xf32> to vector<2x16xf32>
    %21 = arith.subf %19, %20 : vector<2x16xf32>
    %22 = arith.mulf %19, %20 : vector<2x16xf32>
    %23 = tpu.concatenate %19, %20, %21, %22 in 1 : vector<2x16xf32>, vector<2x16xf32>, vector<2x16xf32>, vector<2x16xf32> -> vector<2x64xf32>
    %cst_10 = arith.constant dense<0.000000e+00> : vector<2x16xf32>
    %24 = tpu.matmul %23, %9, %cst_10 {dimension_numbers = #tpu.dot_dimension_numbers<[1], [0], [0], [1], [0, 0, 1, 1], [], []>} : vector<2x64xf32>, vector<64x16xf32>, vector<2x16xf32> -> vector<2x16xf32>
    %c1 = arith.constant 1 : index
    %c0_11 = arith.constant 0 : index
    %25 = vector.load %arg2[%c1, %c0_11] : memref<2x16xf32, #tpu.memory_space<vmem>>, vector<1x16xf32>
    %26 = vector.broadcast %25 : vector<1x16xf32> to vector<2x16xf32>
    %27 = arith.addf %24, %26 : vector<2x16xf32>
    %28 = math.tanh %27 : vector<2x16xf32>
    %c0_12 = arith.constant 0 : index
    %c0_13 = arith.constant 0 : index
    %29 = vector.load %arg3[%c0_12, %c0_13] : memref<16x128xf32, #tpu.memory_space<vmem>>, vector<16x128xf32>
    %cst_14 = arith.constant dense<0.000000e+00> : vector<2x128xf32>
    %30 = tpu.matmul %28, %29, %cst_14 {dimension_numbers = #tpu.dot_dimension_numbers<[1], [0], [0], [1], [0, 0, 1, 1], [], []>} : vector<2x16xf32>, vector<16x128xf32>, vector<2x128xf32> -> vector<2x128xf32>
    %c0_15 = arith.constant 0 : index
    %c0_16 = arith.constant 0 : index
    %31 = vector.load %arg4[%c0_15, %c0_16] : memref<1x128xf32, #tpu.memory_space<vmem>>, vector<1x128xf32>
    %32 = vector.broadcast %31 : vector<1x128xf32> to vector<2x128xf32>
    %33 = arith.addf %30, %32 : vector<2x128xf32>
    %c0_17 = arith.constant 0 : index
    %c0_18 = arith.constant 0 : index
    %34 = vector.load %arg5[%c0_17, %c0_18] : memref<2x128xf32, #tpu.memory_space<vmem>>, vector<2x128xf32>
    tpu.vector_store %arg5[%c0_17, %c0_18], %33 {strides = array<i32>} : memref<2x128xf32, #tpu.memory_space<vmem>>, vector<2x128xf32>,
    return
  }
}

</mosaic_0001>

<bundles_post_ra>
// kernel: tpu_custom_call.1
= control target key start
LH: loop header
LB: loop body
LE: loop exit
PB: predicated region body
PF: predicated region fallthrough
CT: control target
= control target key end

     0   :  { %vm52_vm0 = vcmask 1045504   ;;  %vm30_vm1 = vcmask 1046528   ;;  %v572_v2 = vmov 0.0   ;;  %s573_s30 = smov 64   ;;  %s574_s6 = smov 32   ;;  %s776_s0 = inlined_call_operand.vmem [shape: f32[4,8,32], index: 0, kind: input, shape index: {}]   ;;  %s777_s1 = inlined_call_operand.vmem [shape: f32[160,16], index: 1, kind: input, shape index: {}]   ;;  %s778_s2 = inlined_call_operand.vmem [shape: f32[2,16], index: 2, kind: input, shape index: {}]   ;;  %s779_s3 = inlined_call_operand.vmem [shape: f32[16,128], index: 3, kind: input, shape index: {}]   ;;  %s780_s4 = inlined_call_operand.vmem [shape: f32[1,128], index: 4, kind: input, shape index: {}]   ;;  %s781_s5 = inlined_call_operand.hbm [shape: f32[2,128], index: 5, kind: output, shape index: {}]  }
   0x1   :  { %v612_v0 = vld [vmem:[%s776_s0] sm:$0xff]  ;;  %v54_v3 = vrot.slane %v572_v2, 2  ;;  %v32_v5 = vrot.slane %v572_v2, 1  ;;  %v621_v6 = vld [vmem:[%s776_s0 + $0x8] sm:$0xff]  ;;  %515 = vmatprep.subr.mxu1 %v572_v2  ;;  %v629_v9 = vld [vmem:[%s776_s0 + $0x18] sm:$0xff] }
   0x2   :  { %v53_v1 = vrot.slane %v612_v0, 2  ;;  %v31_v4 = vrot.slane %v612_v0, 1  ;;  %v56_v7 = vrot.slane %v621_v6, 2  ;;  %v34_v8 = vrot.slane %v621_v6, 1  ;;  %v634_v10 = vld [vmem:[%s776_s0 + $0x10] sm:$0xff]  ;;  %v95_v11 = vld [vmem:[%s777_s1 + $0x58] sm:$0xff] }
   0x3   :  { %485 = vmatprep.subr.mxu0 %v95_v11  ;;  %v94_v14 = vld [vmem:[%s777_s1 + $0x50] sm:$0xff]  ;;  %v38_v17 = vrot.slane %v629_v9, 1  ;;  %v36_v18 = vrot.slane %v634_v10, 1  ;;  %v93_v19 = vld [vmem:[%s777_s1 + $0x48] sm:$0xff] }
   0x4   :  { %v55_v12 = vsel %vm52_vm0, %v53_v1, %v54_v3  ;;  %v33_v13 = vsel %vm30_vm1, %v31_v4, %v32_v5  ;;  %v57_v15 = vsel %vm52_vm0, %v56_v7, %v54_v3  ;;  %v35_v16 = vsel %vm30_vm1, %v34_v8, %v32_v5  ;;  %486 = vmatpush3.msra.mxu0 %v95_v11 }
   0x5   :  { %62 = vrot.lane.b32.xlu1 %v55_v12, %s573_s30  ;;  %40 = vrot.lane.b32.xlu0 %v33_v13, %s574_s6 }
   0x6   :  { %487 = vmatprep.subr.mxu0 %v94_v14 }
   0x7   :  { %488 = vmatpush3.msra.mxu0 %v94_v14 }
   0x8   :  { %10 = vsyncpa [#allocation3], 0  ;;  %v92_v20 = vld [vmem:[%s777_s1 + $0x40] sm:$0xff]  ;;  %v39_v21 = vsel %vm30_vm1, %v38_v17, %v32_v5  ;;  %v37_v22 = vsel %vm30_vm1, %v36_v18, %v32_v5  ;;  %v60_v23 = vrot.slane %v629_v9, 2  ;;  %v58_v24 = vrot.slane %v634_v10, 2  ;;  %489 = vmatprep.subr.mxu0 %v93_v19  ;;  %v91_v25 = vld [vmem:[%s777_s1 + $0x38] sm:$0xff] }
   0x9   :  { %64 = vrot.lane.b32.xlu1 %v57_v15, %s573_s30  ;;  %42 = vrot.lane.b32.xlu0 %v35_v16, %s574_s6  ;;  %v90_v28 = vld [vmem:[%s777_s1 + $0x30] sm:$0xff]  ;;  %v89_v29 = vld [vmem:[%s777_s1 + $0x28] sm:$0xff]  ;;  %vm74_vm2 = vcmask 261120   ;;  %vm79_vm3 = vcmask 523264   ;;  %vm109_vm4 = vcmask 785408   ;;  %vm211_vm5 = vcmask 128000  }
   0xa   :  { %490 = vmatpush3.msra.mxu0 %v93_v19  ;;  %v61_v26 = vsel %vm52_vm0, %v60_v23, %v54_v3  ;;  %v59_v27 = vsel %vm52_vm0, %v58_v24, %v54_v3  ;;  %v88_v30 = vld [vmem:[%s777_s1 + $0x20] sm:$0xff]  ;;  %v87_v31 = vld [vmem:[%s777_s1 + $0x18] sm:$0xff]  ;;  %v86_v32 = vld [vmem:[%s777_s1 + $0x10] sm:$0xff]  ;;  %vm246_vm6 = vcmask 1041409   ;;  %vm575_vm7 = vmmov 0   ;;  %s577_s19 = smov 48  }
   0xb   :  { %491 = vmatprep.subr.mxu0 %v92_v20  ;;  %v85_v33 = vld [vmem:[%s777_s1 + $0x8] sm:$0xff]  ;;  %v84_v34 = vld [vmem:[%s777_s1] sm:$0xff]  ;;  %v103_v51 = vld [vmem:[%s777_s1 + $0x98] sm:$0xff]  ;;  %531 = vmatprep.mubr.msk.f32.mxu1 %vm575_vm7, %v572_v2  ;;  %vm267_vm8 = vcmask 130048   ;;  %vm270_vm9 = vcmask 392192  }
   0xc   :  { %492 = vmatpush3.msra.mxu0 %v92_v20  ;;  %v102_v52 = vld [vmem:[%s777_s1 + $0x90] sm:$0xff]  ;;  %516 = vmatpush3.msra.mxu1 %v103_v51  ;;  %v101_v53 = vld [vmem:[%s777_s1 + $0x88] sm:$0xff]  ;;  %v100_v54 = vld [vmem:[%s777_s1 + $0x80] sm:$0xff] }
   0xd   :  { %46 = vrot.lane.b32.xlu1 %v39_v21, %s574_s6  ;;  %44 = vrot.lane.b32.xlu0 %v37_v22, %s574_s6  ;;  %v99_v55 = vld [vmem:[%s777_s1 + $0x78] sm:$0xff]  ;;  %v448_v56 = vld [vmem:[%s778_s2] ss:$0 sm:$0xff] }
   0xe   :  { %493 = vmatprep.subr.mxu0 %v91_v25  ;;  %517 = vmatprep.subr.mxu1 %v572_v2  ;;  %v98_v20 = vld [vmem:[%s777_s1 + $0x70] sm:$0xff]  ;;  %v97_v24 = vld [vmem:[%s777_s1 + $0x68] sm:$0xff] }
   0xf   :  { %494 = vmatpush3.msra.mxu0 %v91_v25  ;;  %518 = vmatpush3.msra.mxu1 %v102_v52  ;;  %v352_v51 = vld [vmem:[%s779_s3 + $0x8] sm:$0xff]  ;;  %v351_v52 = vld [vmem:[%s779_s3] sm:$0xff]  ;;  %s578_s3 = smov [#allocation2]  }
  0x10   :  { %495 = vmatprep.subr.mxu0 %v90_v28  ;;  %519 = vmatprep.subr.mxu1 %v572_v2  ;;  %s440_s27 = sshll.u32 %s578_s3, 4  ;;  %s441_s27 = int_to_ptr.vmem [resolvable:$true] %s440_s27 }
  0x11   :  { %68 = vrot.lane.b32.xlu1 %v61_v26, %s573_s30  ;;  %66 = vrot.lane.b32.xlu0 %v59_v27, %s573_s30  ;;  %s550_s28 = scalar_lea.vmem %s441_s27, 32  ;;  %p555_p1 = scmp.lt.s32.totalorder %s441_s27, %s441_s27 }
  0x12   :  { %496 = vmatpush3.msra.mxu0 %v90_v28  ;;  %520 = vmatpush3.msra.mxu1 %v101_v53  ;;  %v453_v53 = vld [vmem:[%s778_s2 + $0x1] ss:$0 sm:$0xff]  ;;  %p551_p0 = scmp.ne.s32.totalorder %s441_s27, %s550_s28  ;;  %p556_p2 = scmp.lt.s32.totalorder %s550_s28, %s550_s28 }
  0x13   :  { %497 = vmatprep.subr.mxu0 %v89_v29  ;;  %521 = vmatprep.subr.mxu1 %v572_v2 }
  0x14   :  { %498 = vmatpush3.msra.mxu0 %v89_v29  ;;  %522 = vmatpush3.msra.mxu1 %v100_v54  ;;  %v96_v29 = vld [vmem:[%s777_s1 + $0x60] sm:$0xff]  ;;  %s576_s1 = smov 16   ;;  %p557_p3 = por %p556_p2, %p555_p1 }
  0x15   :  { %499 = vmatprep.subr.mxu0 %v88_v30  ;;  %523 = vmatprep.subr.mxu1 %v572_v2 }
  0x16   :  { %500 = vmatpush3.msra.mxu0 %v88_v30  ;;  %524 = vmatpush3.msra.mxu1 %v99_v55  ;;  %p558_p4 = pnand %p557_p3, %p551_p0 }
  0x17   :  { %501 = vmatprep.subr.mxu0 %v87_v31  ;;  %525 = vmatprep.subr.mxu1 %v572_v2 }
  0x18   :  { %502 = vmatpush3.msra.mxu0 %v87_v31  ;;  %526 = vmatpush3.msra.mxu1 %v98_v20 }
  0x19   :  { %503 = vmatprep.subr.mxu0 %v86_v32  ;;  %527 = vmatprep.subr.mxu1 %v572_v2 }
  0x1a   :  { %504 = vmatpush3.msra.mxu0 %v86_v32  ;;  %528 = vmatpush3.msra.mxu1 %v97_v24 }
  0x1b   :  { %505 = vmatprep.subr.mxu0 %v85_v33  ;;  %529 = vmatprep.subr.mxu1 %v572_v2 }
  0x1c   :  { %506 = vmatpush3.msra.mxu0 %v85_v33  ;;  %530 = vmatpush3.msra.mxu1 %v96_v29 }
  0x1d   :  { %507 = vmatprep.subr.mxu0 %v84_v34  ;;  %534 = vmatprep.subr.mxu1 %v572_v2 }
  0x1e   :  { %508 = vmatpush3.msra.mxu0 %v84_v34 }
  0x77   :  { %v63_v35 = vpop.permute.xlu1 %62  ;;  %v41_v36 = vpop.permute.xlu0 %40 }
  0x78   :  { %v75_v37 = vsel %vm74_vm2, %v612_v0, %v41_v36 }
  0x79   :  { %v80_v38 = vsel %vm79_vm3, %v75_v37, %v63_v35 }
  0x7a   :  { %509 = vmatprep.mubr.msk.f32.mxu0 %vm109_vm4, %v80_v38 }
  0x7b   :  { %v65_v39 = vpop.permute.xlu1 %64  ;;  %v43_v40 = vpop.permute.xlu0 %42 }
  0x7c   :  { %v76_v41 = vsel %vm74_vm2, %v621_v6, %v43_v40 }
  0x7d   :  { %v81_v42 = vsel %vm79_vm3, %v76_v41, %v65_v39 }
  0x7e   :  { %510 = vmatmul.mubr.msk.f32.vlgmr.msra.gmra.mxu0 %vm109_vm4, %v81_v42 }
  0x7f   :  { %v47_v43 = vpop.permute.xlu1 %46  ;;  %v45_v44 = vpop.permute.xlu0 %44 }
  0x80   :  { %v78_v45 = vsel %vm74_vm2, %v629_v9, %v47_v43  ;;  %v77_v46 = vsel %vm74_vm2, %v634_v10, %v45_v44 }
  0x83   :  { %v69_v47 = vpop.permute.xlu1 %68  ;;  %v67_v48 = vpop.permute.xlu0 %66 }
  0x84   :  { %v83_v49 = vsel %vm79_vm3, %v78_v45, %v69_v47  ;;  %v82_v50 = vsel %vm79_vm3, %v77_v46, %v67_v48 }
  0x85   :  { %512 = vmatprep.mubr.msk.f32.mxu0 %vm109_vm4, %v82_v50 }
  0x86   :  { %513 = vmatmul.mubr.msk.f32.gmra.mxu0 %vm109_vm4, %v83_v49 }
 0x13e   :  { %v511_v57 = vpop.f32.mrf.mxu0 }
 0x13f   :  { %v194_v58 = vadd.f32 %v511_v57, %v448_v56 }
 0x140   :  { %v188_v59 = vpop.f32.mrf.mxu0 }
 0x141   :  { %v208_v60 = vmax.f32 %v194_v58, 0.0  ;;  %v189_v61 = vadd.f32 %v448_v56, %v188_v59  ;;  %v455_v58 = vld [vmem:[%s780_s4] ss:$0 sm:$0xff] }
 0x143   :  { %v219_v62 = vsel %vm211_vm5, %v208_v60, -inf  ;;  %v207_v63 = vmax.f32 %v189_v61, 0.0 }
 0x144   :  { %v220_v0 = vrot.slane %v219_v62, 4 }
 0x145   :  { %v212_v1 = vsel %vm211_vm5, %v207_v63, -inf }
 0x146   :  { %v221_v3 = vmax.f32 %v219_v62, %v220_v0  ;;  %v213_v4 = vrot.slane %v212_v1, 4  ;;  %v514_v5 = vpop.f32.mrf.mxu0 }
 0x147   :  { %v204_v6 = vadd.f32 %v514_v5, %v448_v56 }
 0x148   :  { %v222_v7 = vrot.slane %v221_v3, 2  ;;  %v214_v8 = vmax.f32 %v212_v1, %v213_v4  ;;  %v198_v9 = vpop.f32.mrf.mxu0 }
 0x149   :  { %v210_v10 = vmax.f32 %v204_v6, 0.0  ;;  %v199_v11 = vadd.f32 %v448_v56, %v198_v9 }
 0x14a   :  { %v223_v12 = vmax.f32 %v221_v3, %v222_v7  ;;  %v215_v13 = vrot.slane %v214_v8, 2 }
 0x14b   :  { %v233_v14 = vsel %vm211_vm5, %v210_v10, -inf  ;;  %v209_v15 = vmax.f32 %v199_v11, 0.0 }
 0x14c   :  { %v224_v16 = vrot.slane %v223_v12, 1  ;;  %v216_v17 = vmax.f32 %v214_v8, %v215_v13  ;;  %v234_v18 = vrot.slane %v233_v14, 4 }
 0x14d   :  { %v226_v19 = vsel %vm211_vm5, %v209_v15, -inf }
 0x14e   :  { %v217_v21 = vrot.slane %v216_v17, 1  ;;  %v235_v22 = vmax.f32 %v233_v14, %v234_v18  ;;  %v227_v23 = vrot.slane %v226_v19, 4  ;;  %v225_v25 = vmax.f32 %v223_v12, %v224_v16 }
 0x150   :  { %v218_v26 = vmax.f32 %v216_v17, %v217_v21  ;;  %v236_v27 = vrot.slane %v235_v22, 2  ;;  %v228_v28 = vmax.f32 %v226_v19, %v227_v23 }
 0x152   :  { %v237_v30 = vmax.f32 %v235_v22, %v236_v27  ;;  %v229_v31 = vrot.slane %v228_v28, 2  ;;  %v247_v32 = vsel %vm246_vm6, %v225_v25, %v218_v26 }
 0x154   :  { %v238_v33 = vrot.slane %v237_v30, 1  ;;  %v230_v34 = vmax.f32 %v228_v28, %v229_v31 }
 0x156   :  { %v231_v35 = vrot.slane %v230_v34, 1  ;;  %v239_v36 = vmax.f32 %v237_v30, %v238_v33 }
 0x158   :  { %v232_v37 = vmax.f32 %v230_v34, %v231_v35  ;;  %v241_v40 = vsub.f32 %v225_v25, %v239_v36  ;;  %v243_v43 = vmul.f32 %v239_v36, %v225_v25 }
 0x15a   :  { %v251_v38 = vsel %vm246_vm6, %v239_v36, %v232_v37  ;;  %v240_v39 = vsub.f32 %v218_v26, %v232_v37  ;;  %v242_v41 = vmul.f32 %v232_v37, %v218_v26 }
 0x15b   :  { %252 = vrot.lane.b32.xlu0 %v251_v38, %s576_s1 }
 0x15c   :  { %v257_v42 = vsel %vm246_vm6, %v241_v40, %v240_v39  ;;  %v263_v44 = vsel %vm246_vm6, %v243_v43, %v242_v41 }
 0x15d   :  { %258 = vrot.lane.b32.xlu1 %v257_v42, %s574_s6 }
 0x15f   :  { %264 = vrot.lane.b32.xlu0 %v263_v44, %s577_s19 }
 0x1cd   :  { %v253_v45 = vpop.permute.xlu0 %252 }
 0x1ce   :  { %v268_v46 = vsel %vm267_vm8, %v247_v32, %v253_v45 }
 0x1cf   :  { %v259_v47 = vpop.permute.xlu1 %258 }
 0x1d0   :  { %v269_v48 = vsel %vm74_vm2, %v268_v46, %v259_v47 }
 0x1d1   :  { %v265_v49 = vpop.permute.xlu0 %264 }
 0x1d2   :  { %v271_v50 = vsel %vm270_vm9, %v269_v48, %v265_v49 }
 0x1d3   :  { %532 = vmatmul.mubr.msk.f32.vlgmr.msra.gmra.mxu1 %vm79_vm3, %v271_v50 }
 0x1d4   :  { %538 = vmatprep.mubr.msk.f32.mxu1 %vm575_vm7, %v572_v2  ;;  %535 = vmatpush3.msra.mxu1 %v352_v51 }
 0x1d5   :  { %536 = vmatprep.subr.mxu1 %v572_v2 }
 0x1d6   :  { %537 = vmatpush3.msra.mxu1 %v351_v52 }
 0x293   :  { %v346_v54 = vpop.f32.mrf.mxu1 }
 0x294   :  { %v347_v55 = vadd.f32 %v453_v53, %v346_v54 }
 0x295   :  { %v533_v56 = vpop.f32.mrf.mxu1 }
 0x296   :  { %548 = vtanh.f32 %v347_v55 }
 0x2a3   :  { %v549_v57 = vpop.eup %548 }
 0x2a4   :  { %539 = vmatmul.mubr.msk.f32.vlgmr.msra.gmra.mxu1 %vm267_vm8, %v549_v57 }
 0x364   :  { %v429_v59 = vpop.f32.mrf.mxu1 }
 0x365   :  { %v430_v2 = vadd.f32 %v455_v58, %v429_v59 }
 0x366   :  { %v540_v60 = vpop.f32.mrf.mxu1 }
 0x367   :  { %433 = vst [vmem:[#allocation2] sm:$0x3] %v430_v2 }
 0x368   :  { %561 = shalt.err (!%p558_p4)
}
 0x369   :  { %443 = dma.vmem_to_hbm [thread:$0]  %s441_s27, 32, %s781_s5, [#allocation3]  }
 0x36a   :  { %570 = dma.done.wait [#allocation3], 32  }
 0x36b   :  { %571 = vsyncadd [#allocation3], 4294967264 }
 0x36c   :  { %447 = vsyncpa [#allocation3], 1 }

</bundles_post_ra>
